<compile_context>
chip_gen: v5e
topology: v5e:2x2
jax: 0.10.0
libtpu: 0.0.40
codegen_flags: <defaults>
</compile_context>

<pallas_src>
import math

import jax
import jax.numpy as jnp
from jax import lax
from jax.experimental import pallas as pl
from jax.experimental.pallas import tpu as pltpu

# ----------------------------- configuration --------------------------------
B = 2            # bags (samples)
C = 1            # channels
Z = 8            # instances per bag (z-slices)
H = W = 16
L = 32           # per-instance feature dim (attention_L)
NUM_BINS = 8     # distribution pooling bins (J)
SIGMA = 0.1
N_CLASSES = 4
D_IN = C * H * W
LJ = L * NUM_BINS                      # 256: lane-dense pooling width

ALFA = 1.0 / math.sqrt(2.0 * math.pi * SIGMA ** 2)   # cancels in kernel; kept for the reference
BETA = -1.0 / (2.0 * SIGMA ** 2)

# Row offsets inside the packed f32 weight slab (all 8-sublane aligned).
ROW_AB1 = 0      # wab1                       (L, 256)
ROW_AB2 = 32     # wab2^T (block-diag heads)  (2, 256)
ROW_R1 = 40      # wr1^T, bin-major columns   (128, 256)
ROW_R2 = 168     # wr2^T                      (32, 128)
ROW_R3 = 200     # wr3^T                      (4, 32)
W_ROWS = 208

OUT_PAD_SUB = 8
OUT_PAD_LANE = 128

_NT = (((1,), (1,)), ((), ()))         # contract dim 1 of both operands (A @ B^T)


# ------------------------- fused MIL per-bag kernel --------------------------
def _mil_bag_kernel(x_ref, wm_ref, w_ref, c_ref, o_ref):
    f32 = jnp.float32

    # ---- backbone (synthetic per-instance Linear) + branch-entry sigmoid ----
    # bf16 operands, f32 accumulation: native MXU rate.
    y = jax.nn.sigmoid(
        jnp.dot(x_ref[...], wm_ref[...], preferred_element_type=f32)
        + c_ref[0:1, 0:L])                                               # (Z, L)

    # ---- Attention & Attention2, fused: one (L,256) FC + one block-diag FC ----
    h = jnp.tanh(
        jnp.dot(y, w_ref[ROW_AB1:ROW_AB1 + L, :], preferred_element_type=f32)
        + c_ref[1:2, :])                                                 # (Z, 256)
    logits2 = lax.dot_general(h, w_ref[ROW_AB2:ROW_AB2 + 2, :], _NT,
                              preferred_element_type=f32) + c_ref[2:3, 0:2]  # (Z, 2)
    la = logits2[:, 0:1]                          # Attention logits      (Z, 1)
    att2 = jax.nn.sigmoid(logits2[:, 1:2])        # Attention2 gate       (Z, 1)

    # Per-bag softmax of `la`: the per-bag denominator cancels exactly in
    # out_un / norm below, so only exp(la - per_bag_max) is needed.
    ea = jnp.exp(la - jnp.max(la, axis=0, keepdims=True))                # (Z, 1)

    data = att2 * y                                                      # (Z, L)

    # ---- DistributionPoolingFilter, BIN-MAJOR lane layout (lane = j*L + f) ----
    # "repeat each feature over its J bins" == tile the L feature lanes J times
    # (exact, no matmul, no bf16 truncation before the Gaussian).
    data_rep = jnp.concatenate([data] * NUM_BINS, axis=1)                # (Z, LJ)
    diff = c_ref[3:4, :] - data_rep        # bin-major sample points - data
    # ALFA dropped: it scales numerator and denominator identically.
    g = jnp.exp(BETA * diff * diff)                                      # (Z, LJ)
    out_un = jnp.sum(ea * g, axis=0, keepdims=True)                      # (1, LJ)  XLU reduce

    # Per-feature normalizer: sum of the J bin blocks, then re-tile (exact).
    norm_f = out_un[:, 0:L]
    for j in range(1, NUM_BINS):
        norm_f = norm_f + out_un[:, j * L:(j + 1) * L]                   # (1, L)
    norm = jnp.concatenate([norm_f] * NUM_BINS, axis=1)                  # (1, LJ)
    pooled = out_un / norm                                               # (1, LJ)

    # ---- RepresentationTransformation: L*J -> 128 -> 32 -> n_classes (ReLU) ----
    v = jnp.maximum(
        lax.dot_general(pooled, w_ref[ROW_R1:ROW_R1 + 128, :], _NT,
                        preferred_element_type=f32) + c_ref[4:5, 0:128], 0.0)
    v = jnp.maximum(
        lax.dot_general(v, w_ref[ROW_R2:ROW_R2 + 32, 0:128], _NT,
                        preferred_element_type=f32) + c_ref[5:6, 0:32], 0.0)
    logits = lax.dot_general(v, w_ref[ROW_R3:ROW_R3 + N_CLASSES, 0:32], _NT,
                             preferred_element_type=f32) + c_ref[6:7, 0:N_CLASSES]

    # Lane/sublane-padded output block; the wrapper slices [:, 0, :N_CLASSES].
    o_ref[...] = jnp.zeros_like(o_ref)
    o_ref[0, 0:1, 0:N_CLASSES] = logits


@jax.jit
def mil_forward(x, kparams):
    wm_bf, wslab, cslab = kparams
    b, c, z, hh, ww = x.shape
    # samples_and_instances_to_first_axis: view(-1, C, H, W), then flatten.
    # TODO(synk): this reshape matches the torch view semantics only for C == 1.
    x_reshape = jnp.reshape(x, (-1, c, hh, ww))
    x_flat = jnp.reshape(x_reshape, (x_reshape.shape[0], -1)).astype(jnp.bfloat16)

    out = pl.pallas_call(
        _mil_bag_kernel,
        out_shape=jax.ShapeDtypeStruct((b, OUT_PAD_SUB, OUT_PAD_LANE), jnp.float32),
        grid=(b,),
        in_specs=[
            pl.BlockSpec((Z, D_IN), lambda i: (i, 0)),      # per-bag instance tile (bf16)
            pl.BlockSpec((D_IN, L), lambda i: (0, 0)),      # backbone weight, resident
            pl.BlockSpec((W_ROWS, LJ), lambda i: (0, 0)),   # packed f32 weight slab, resident
            pl.BlockSpec((8, LJ), lambda i: (0, 0)),        # packed bias/const slab, resident
        ],
        out_specs=pl.BlockSpec((1, OUT_PAD_SUB, OUT_PAD_LANE), lambda i: (i, 0, 0)),
        compiler_params=pltpu.CompilerParams(
            dimension_semantics=("parallel",)),             # v7x: bags shard across TCs
    )(x_flat, wm_bf, wslab, cslab)
    return out[:, 0, :N_CLASSES]


# ------------------- host-side (one-time) parameter packing ------------------
def build_kernel_params(params):
    (wm, bm), (wa1, ba1, wa2, ba2, wb1, bb1, wb2, bb2,
               sp, wr1, br1, wr2, br2, wr3, br3) = params

    wm_bf = wm.astype(jnp.bfloat16)                              # bf16 weights for MXU

    # Fused attention first FC.
    wab1 = jnp.concatenate([wa1, wb1], axis=1)                   # (L, 256)
    bab1 = jnp.concatenate([ba1, bb1], axis=1)                   # (1, 256)
    # Block-diagonal second FC, stored transposed: (2, 256).
    z128 = jnp.zeros((1, 128), jnp.float32)
    wab2t = jnp.concatenate(
        [jnp.concatenate([wa2.T, z128], axis=1),
         jnp.concatenate([z128, wb2.T], axis=1)], axis=0)        # (2, 256)
    bab2 = jnp.concatenate([ba2, bb2], axis=1)                   # (1, 2)

    # Bin-major reordering: kernel lane p = j*L + f  <->  torch index f*J + j.
    p = jnp.arange(LJ)
    perm = (p % L) * NUM_BINS + (p // L)
    wr1t_bm = wr1[perm, :].T                                     # (128, 256)
    wr2t = wr2.T                                                 # (32, 128)
    wr3t = wr3.T                                                 # (4, 32)
    sp_bm = jnp.repeat(sp.reshape(-1), L).reshape(1, LJ)         # sample points, bin-major

    # Packed f32 weight slab: one DMA, resident across grid steps.
    wslab = jnp.zeros((W_ROWS, LJ), jnp.float32)
    for r0, arr in ((ROW_AB1, wab1), (ROW_AB2, wab2t), (ROW_R1, wr1t_bm),
                    (ROW_R2, wr2t), (ROW_R3, wr3t)):
        wslab = wslab.at[r0:r0 + arr.shape[0], 0:arr.shape[1]].set(arr)

    # Packed bias / constant slab (8, 256): all (1,N) biases + sample points.
    cslab = jnp.zeros((8, LJ), jnp.float32)
    cslab = cslab.at[0, 0:L].set(bm[0])
    cslab = cslab.at[1, :].set(bab1[0])
    cslab = cslab.at[2, 0:2].set(bab2[0])
    cslab = cslab.at[3, :].set(sp_bm[0])
    cslab = cslab.at[4, 0:128].set(br1[0])
    cslab = cslab.at[5, 0:32].set(br2[0])
    cslab = cslab.at[6, 0:N_CLASSES].set(br3[0])

    return (wm_bf, wslab, cslab)


# -------------------------- pure-JAX reference -------------------------------
def mil_forward_ref(x, params):
    (wm, bm), (wa1, ba1, wa2, ba2, wb1, bb1, wb2, bb2,
               sp, wr1, br1, wr2, br2, wr3, br3) = params
    b, c, z, h, w = x.shape
    x_reshape = jnp.reshape(x, (-1, c, h, w))
    x_flat = jnp.reshape(x_reshape, (x_reshape.shape[0], -1))
    # backbone module (bf16 operands, f32 accumulation, same as the kernel)
    y = jnp.dot(x_flat.astype(jnp.bfloat16), wm.astype(jnp.bfloat16),
                preferred_element_type=jnp.float32) + bm
    y = jnp.reshape(y, (b, -1, y.shape[-1]))
    y = jax.nn.sigmoid(y)
    y2 = y.reshape(-1, L)
    att = jax.nn.softmax(
        ((jnp.tanh(y2 @ wa1 + ba1) @ wa2) + ba2).reshape(b, -1, 1), axis=1)
    att2 = jax.nn.sigmoid(
        ((jnp.tanh(y2 @ wb1 + bb1) @ wb2) + bb2).reshape(b, -1, 1))
    data = att2 * y
    diff = sp.reshape(1, 1, 1, NUM_BINS) - data[..., None]
    result = ALFA * jnp.exp(BETA * diff ** 2)
    result = att[..., None] * result
    out_un = jnp.sum(result, axis=1)
    norm = jnp.sum(out_un, axis=2, keepdims=True)
    pooled = (out_un / norm).reshape(b, L * NUM_BINS)
    v = jnp.maximum(pooled @ wr1 + br1, 0.0)
    v = jnp.maximum(v @ wr2 + br2, 0.0)
    return v @ wr3 + br3


# --------------------------- deterministic init -------------------------------
def _linear(key, fan_in, fan_out):
    kw, kb = jax.random.split(key)
    bound = 1.0 / math.sqrt(fan_in)
    w = jax.random.uniform(kw, (fan_in, fan_out), jnp.float32, -bound, bound)
    b = jax.random.uniform(kb, (1, fan_out), jnp.float32, -bound, bound)
    return w, b


def init_params(key):
    keys = jax.random.split(key, 8)
    wm, bm = _linear(keys[0], D_IN, L)            # synthetic backbone module
    wa1, ba1 = _linear(keys[1], L, 128)           # Attention fc[0]
    wa2, ba2 = _linear(keys[2], 128, 1)           # Attention fc[2]
    wb1, bb1 = _linear(keys[3], L, 128)           # Attention2 fc[0]
    wb2, bb2 = _linear(keys[4], 128, 1)           # Attention2 fc[2]
    sp = jnp.linspace(0.0, 1.0, NUM_BINS,
                      dtype=jnp.float32).reshape(1, NUM_BINS)  # sample_points
    wr1, br1 = _linear(keys[5], L * NUM_BINS, 128)
    wr2, br2 = _linear(keys[6], 128, 32)
    wr3, br3 = _linear(keys[7], 32, N_CLASSES)
    head = (wa1, ba1, wa2, ba2, wb1, bb1, wb2, bb2,
            sp, wr1, br1, wr2, br2, wr3, br3)
    return (wm, bm), head


# ----------------------------------- main -------------------------------------
if __name__ == "__main__":
    key = jax.random.PRNGKey(0)
    kx, kp = jax.random.split(key)
    x = jax.random.normal(kx, (B, C, Z, H, W), dtype=jnp.float32)
    params = init_params(kp)
    kparams = build_kernel_params(params)

    out = jax.block_until_ready(mil_forward(x, kparams))
    ref = mil_forward_ref(x, params)

    assert out.shape == (B, N_CLASSES), out.shape
    assert jnp.allclose(out, ref, rtol=1e-4, atol=1e-4), (out, ref)
    print("KERNEL_OK")
</pallas_src>

<mosaic_0001>
module attributes {stable_mosaic.version = 11 : i64} {
  func.func @_mil_bag_kernel(%arg0: i32, %arg1: memref<8x256xbf16, #tpu.memory_space<vmem>>, %arg2: memref<256x32xbf16, #tpu.memory_space<vmem>>, %arg3: memref<208x256xf32, #tpu.memory_space<vmem>>, %arg4: memref<8x256xf32, #tpu.memory_space<vmem>>, %arg5: memref<1x8x128xf32, #tpu.memory_space<vmem>>) attributes {dimension_semantics = [#tpu.dimension_semantics<parallel>], iteration_bounds = array<i64: 2>, scalar_prefetch = 0 : i64, scratch_operands = 0 : i64, tpu.core_type = #tpu.core_type<tc>, window_params = [{transform_indices = @transform_0, window_bounds = array<i64: 8, 256>}, {pipeline_mode = #tpu.pipeline_mode<synchronous>, transform_indices = @transform_1, window_bounds = array<i64: 256, 32>}, {pipeline_mode = #tpu.pipeline_mode<synchronous>, transform_indices = @transform_2, window_bounds = array<i64: 208, 256>}, {pipeline_mode = #tpu.pipeline_mode<synchronous>, transform_indices = @transform_3, window_bounds = array<i64: 8, 256>}, {transform_indices = @transform_4, window_bounds = array<i64: 1, 8, 128>}]} {
    %c0 = arith.constant 0 : index
    %c0_0 = arith.constant 0 : index
    %0 = vector.load %arg1[%c0, %c0_0] : memref<8x256xbf16, #tpu.memory_space<vmem>>, vector<8x256xbf16>
    %c0_1 = arith.constant 0 : index
    %c0_2 = arith.constant 0 : index
    %1 = vector.load %arg2[%c0_1, %c0_2] : memref<256x32xbf16, #tpu.memory_space<vmem>>, vector<256x32xbf16>
    %cst = arith.constant dense<0.000000e+00> : vector<8x32xf32>
    %2 = tpu.matmul %0, %1, %cst {dimension_numbers = #tpu.dot_dimension_numbers<[1], [0], [0], [1], [0, 0, 1, 1], [], []>} : vector<8x256xbf16>, vector<256x32xbf16>, vector<8x32xf32> -> vector<8x32xf32>
    %c0_3 = arith.constant 0 : index
    %c0_4 = arith.constant 0 : index
    %3 = vector.load %arg4[%c0_3, %c0_4] : memref<8x256xf32, #tpu.memory_space<vmem>>, vector<1x32xf32>
    %4 = vector.broadcast %3 : vector<1x32xf32> to vector<8x32xf32>
    %5 = arith.addf %2, %4 : vector<8x32xf32>
    %6 = arith.negf %5 : vector<8x32xf32>
    %7 = math.exp %6 : vector<8x32xf32>
    %cst_5 = arith.constant 1.000000e+00 : f32
    %8 = vector.broadcast %cst_5 : f32 to vector<8x32xf32>
    %9 = arith.addf %8, %7 : vector<8x32xf32>
    %10 = arith.divf %8, %9 : vector<8x32xf32>
    %c0_6 = arith.constant 0 : index
    %c0_7 = arith.constant 0 : index
    %11 = vector.load %arg3[%c0_6, %c0_7] : memref<208x256xf32, #tpu.memory_space<vmem>>, vector<32x256xf32>
    %cst_8 = arith.constant dense<0.000000e+00> : vector<8x256xf32>
    %12 = tpu.matmul %10, %11, %cst_8 {dimension_numbers = #tpu.dot_dimension_numbers<[1], [0], [0], [1], [0, 0, 1, 1], [], []>} : vector<8x32xf32>, vector<32x256xf32>, vector<8x256xf32> -> vector<8x256xf32>
    %c1 = arith.constant 1 : index
    %c0_9 = arith.constant 0 : index
    %13 = vector.load %arg4[%c1, %c0_9] : memref<8x256xf32, #tpu.memory_space<vmem>>, vector<1x256xf32>
    %14 = vector.broadcast %13 : vector<1x256xf32> to vector<8x256xf32>
    %15 = arith.addf %12, %14 : vector<8x256xf32>
    %16 = math.tanh %15 : vector<8x256xf32>
    %c32 = arith.constant 32 : index
    %c0_10 = arith.constant 0 : index
    %17 = vector.load %arg3[%c32, %c0_10] : memref<208x256xf32, #tpu.memory_space<vmem>>, vector<2x256xf32>
    %cst_11 = arith.constant dense<0.000000e+00> : vector<8x2xf32>
    %18 = tpu.matmul %16, %17, %cst_11 {dimension_numbers = #tpu.dot_dimension_numbers<[1], [1], [0], [0], [0, 0, 1, 0], [], []>} : vector<8x256xf32>, vector<2x256xf32>, vector<8x2xf32> -> vector<8x2xf32>
    %c2 = arith.constant 2 : index
    %c0_12 = arith.constant 0 : index
    %19 = vector.load %arg4[%c2, %c0_12] : memref<8x256xf32, #tpu.memory_space<vmem>>, vector<1x2xf32>
    %20 = vector.broadcast %19 : vector<1x2xf32> to vector<8x2xf32>
    %21 = arith.addf %18, %20 : vector<8x2xf32>
    %22 = vector.extract_strided_slice %21 {offsets = [0, 0], sizes = [8, 1], strides = [1, 1]} : vector<8x2xf32> to vector<8x1xf32>
    %23 = vector.extract_strided_slice %21 {offsets = [0, 1], sizes = [8, 1], strides = [1, 1]} : vector<8x2xf32> to vector<8x1xf32>
    %24 = arith.negf %23 : vector<8x1xf32>
    %25 = math.exp %24 : vector<8x1xf32>
    %cst_13 = arith.constant 1.000000e+00 : f32
    %26 = vector.broadcast %cst_13 : f32 to vector<8x1xf32>
    %27 = arith.addf %26, %25 : vector<8x1xf32>
    %28 = arith.divf %26, %27 : vector<8x1xf32>
    %cst_14 = arith.constant dense<0xFF800000> : vector<1xf32>
    %29 = vector.multi_reduction <maximumf>, %22, %cst_14 [0] : vector<8x1xf32> to vector<1xf32>
    %30 = vector.shape_cast %29 : vector<1xf32> to vector<1x1xf32>
    %31 = vector.broadcast %30 : vector<1x1xf32> to vector<8x1xf32>
    %32 = arith.subf %22, %31 : vector<8x1xf32>
    %33 = math.exp %32 : vector<8x1xf32>
    %34 = vector.broadcast %28 : vector<8x1xf32> to vector<8x32xf32>
    %35 = arith.mulf %34, %10 : vector<8x32xf32>
    %36 = tpu.concatenate %35, %35, %35, %35, %35, %35, %35, %35 in 1 : vector<8x32xf32>, vector<8x32xf32>, vector<8x32xf32>, vector<8x32xf32>, vector<8x32xf32>, vector<8x32xf32>, vector<8x32xf32>, vector<8x32xf32> -> vector<8x256xf32>
    %c3 = arith.constant 3 : index
    %c0_15 = arith.constant 0 : index
    %37 = vector.load %arg4[%c3, %c0_15] : memref<8x256xf32, #tpu.memory_space<vmem>>, vector<1x256xf32>
    %38 = vector.broadcast %37 : vector<1x256xf32> to vector<8x256xf32>
    %39 = arith.subf %38, %36 : vector<8x256xf32>
    %cst_16 = arith.constant -5.000000e+01 : f32
    %40 = vector.broadcast %cst_16 : f32 to vector<8x256xf32>
    %41 = arith.mulf %40, %39 : vector<8x256xf32>
    %42 = arith.mulf %41, %39 : vector<8x256xf32>
    %43 = math.exp %42 : vector<8x256xf32>
    %44 = vector.broadcast %33 : vector<8x1xf32> to vector<8x256xf32>
    %45 = arith.mulf %44, %43 : vector<8x256xf32>
    %cst_17 = arith.constant dense<0.000000e+00> : vector<256xf32>
    %46 = vector.multi_reduction <add>, %45, %cst_17 [0] : vector<8x256xf32> to vector<256xf32>
    %47 = vector.shape_cast %46 : vector<256xf32> to vector<1x256xf32>
    %48 = vector.extract_strided_slice %47 {offsets = [0, 0], sizes = [1, 32], strides = [1, 1]} : vector<1x256xf32> to vector<1x32xf32>
    %49 = vector.extract_strided_slice %47 {offsets = [0, 32], sizes = [1, 32], strides = [1, 1]} : vector<1x256xf32> to vector<1x32xf32>
    %50 = arith.addf %48, %49 : vector<1x32xf32>
    %51 = vector.extract_strided_slice %47 {offsets = [0, 64], sizes = [1, 32], strides = [1, 1]} : vector<1x256xf32> to vector<1x32xf32>
    %52 = arith.addf %50, %51 : vector<1x32xf32>
    %53 = vector.extract_strided_slice %47 {offsets = [0, 96], sizes = [1, 32], strides = [1, 1]} : vector<1x256xf32> to vector<1x32xf32>
    %54 = arith.addf %52, %53 : vector<1x32xf32>
    %55 = vector.extract_strided_slice %47 {offsets = [0, 128], sizes = [1, 32], strides = [1, 1]} : vector<1x256xf32> to vector<1x32xf32>
    %56 = arith.addf %54, %55 : vector<1x32xf32>
    %57 = vector.extract_strided_slice %47 {offsets = [0, 160], sizes = [1, 32], strides = [1, 1]} : vector<1x256xf32> to vector<1x32xf32>
    %58 = arith.addf %56, %57 : vector<1x32xf32>
    %59 = vector.extract_strided_slice %47 {offsets = [0, 192], sizes = [1, 32], strides = [1, 1]} : vector<1x256xf32> to vector<1x32xf32>
    %60 = arith.addf %58, %59 : vector<1x32xf32>
    %61 = vector.extract_strided_slice %47 {offsets = [0, 224], sizes = [1, 32], strides = [1, 1]} : vector<1x256xf32> to vector<1x32xf32>
    %62 = arith.addf %60, %61 : vector<1x32xf32>
    %63 = tpu.concatenate %62, %62, %62, %62, %62, %62, %62, %62 in 1 : vector<1x32xf32>, vector<1x32xf32>, vector<1x32xf32>, vector<1x32xf32>, vector<1x32xf32>, vector<1x32xf32>, vector<1x32xf32>, vector<1x32xf32> -> vector<1x256xf32>
    %64 = arith.divf %47, %63 : vector<1x256xf32>
    %c40 = arith.constant 40 : index
    %c0_18 = arith.constant 0 : index
    %65 = vector.load %arg3[%c40, %c0_18] : memref<208x256xf32, #tpu.memory_space<vmem>>, vector<128x256xf32>
    %cst_19 = arith.constant dense<0.000000e+00> : vector<1x128xf32>
    %66 = tpu.matmul %64, %65, %cst_19 {dimension_numbers = #tpu.dot_dimension_numbers<[1], [1], [0], [0], [0, 0, 1, 0], [], []>} : vector<1x256xf32>, vector<128x256xf32>, vector<1x128xf32> -> vector<1x128xf32>
    %c4 = arith.constant 4 : index
    %c0_20 = arith.constant 0 : index
    %67 = vector.load %arg4[%c4, %c0_20] : memref<8x256xf32, #tpu.memory_space<vmem>>, vector<1x128xf32>
    %68 = arith.addf %66, %67 : vector<1x128xf32>
    %cst_21 = arith.constant 0.000000e+00 : f32
    %69 = vector.broadcast %cst_21 : f32 to vector<1x128xf32>
    %70 = arith.maximumf %68, %69 : vector<1x128xf32>
    %c168 = arith.constant 168 : index
    %c0_22 = arith.constant 0 : index
    %71 = vector.load %arg3[%c168, %c0_22] : memref<208x256xf32, #tpu.memory_space<vmem>>, vector<32x128xf32>
    %cst_23 = arith.constant dense<0.000000e+00> : vector<1x32xf32>
    %72 = tpu.matmul %70, %71, %cst_23 {dimension_numbers = #tpu.dot_dimension_numbers<[1], [1], [0], [0], [0, 0, 1, 0], [], []>} : vector<1x128xf32>, vector<32x128xf32>, vector<1x32xf32> -> vector<1x32xf32>
    %c5 = arith.constant 5 : index
    %c0_24 = arith.constant 0 : index
    %73 = vector.load %arg4[%c5, %c0_24] : memref<8x256xf32, #tpu.memory_space<vmem>>, vector<1x32xf32>
    %74 = arith.addf %72, %73 : vector<1x32xf32>
    %cst_25 = arith.constant 0.000000e+00 : f32
    %75 = vector.broadcast %cst_25 : f32 to vector<1x32xf32>
    %76 = arith.maximumf %74, %75 : vector<1x32xf32>
    %c200 = arith.constant 200 : index
    %c0_26 = arith.constant 0 : index
    %77 = vector.load %arg3[%c200, %c0_26] : memref<208x256xf32, #tpu.memory_space<vmem>>, vector<4x32xf32>
    %cst_27 = arith.constant dense<0.000000e+00> : vector<1x4xf32>
    %78 = tpu.matmul %76, %77, %cst_27 {dimension_numbers = #tpu.dot_dimension_numbers<[1], [1], [0], [0], [0, 0, 1, 0], [], []>} : vector<1x32xf32>, vector<4x32xf32>, vector<1x4xf32> -> vector<1x4xf32>
    %c6 = arith.constant 6 : index
    %c0_28 = arith.constant 0 : index
    %79 = vector.load %arg4[%c6, %c0_28] : memref<8x256xf32, #tpu.memory_space<vmem>>, vector<1x4xf32>
    %80 = arith.addf %78, %79 : vector<1x4xf32>
    %cst_29 = arith.constant 0.000000e+00 : f32
    %81 = vector.broadcast %cst_29 : f32 to vector<1x8x128xf32>
    %c0_30 = arith.constant 0 : index
    %c0_31 = arith.constant 0 : index
    %c0_32 = arith.constant 0 : index
    %82 = vector.load %arg5[%c0_30, %c0_31, %c0_32] : memref<1x8x128xf32, #tpu.memory_space<vmem>>, vector<1x8x128xf32>
    tpu.vector_store %arg5[%c0_30, %c0_31, %c0_32], %81 {strides = array<i32>} : memref<1x8x128xf32, #tpu.memory_space<vmem>>, vector<1x8x128xf32>,
    %c0_33 = arith.constant 0 : index
    %c0_34 = arith.constant 0 : index
    %c0_35 = arith.constant 0 : index
    %83 = vector.load %arg5[%c0_33, %c0_34, %c0_35] : memref<1x8x128xf32, #tpu.memory_space<vmem>>, vector<1x1x4xf32>
    %84 = vector.shape_cast %83 : vector<1x1x4xf32> to vector<1x4xf32>
    %85 = vector.shape_cast %80 : vector<1x4xf32> to vector<1x1x4xf32>
    tpu.vector_store %arg5[%c0_33, %c0_34, %c0_35], %85 {strides = array<i32>} : memref<1x8x128xf32, #tpu.memory_space<vmem>>, vector<1x1x4xf32>,
    return
  }
  func.func @transform_0(%arg0: i32) -> (i32, i32) {
    %c0_i32 = arith.constant 0 : i32
    %c0_i32_0 = arith.constant 0 : i32
    return %arg0, %c0_i32 : i32, i32
  }
  func.func @transform_1(%arg0: i32) -> (i32, i32) {
    %c0_i32 = arith.constant 0 : i32
    %c0_i32_0 = arith.constant 0 : i32
    %c0_i32_1 = arith.constant 0 : i32
    return %c0_i32, %c0_i32_0 : i32, i32
  }
  func.func @transform_2(%arg0: i32) -> (i32, i32) {
    %c0_i32 = arith.constant 0 : i32
    %c0_i32_0 = arith.constant 0 : i32
    %c0_i32_1 = arith.constant 0 : i32
    return %c0_i32, %c0_i32_0 : i32, i32
  }
  func.func @transform_3(%arg0: i32) -> (i32, i32) {
    %c0_i32 = arith.constant 0 : i32
    %c0_i32_0 = arith.constant 0 : i32
    %c0_i32_1 = arith.constant 0 : i32
    return %c0_i32, %c0_i32_0 : i32, i32
  }
  func.func @transform_4(%arg0: i32) -> (i32, i32, i32) {
    %c0_i32 = arith.constant 0 : i32
    %c0_i32_0 = arith.constant 0 : i32
    %c0_i32_1 = arith.constant 0 : i32
    return %arg0, %c0_i32, %c0_i32_0 : i32, i32, i32
  }
}

</mosaic_0001>

<bundles_post_ra>
// kernel: mil_forward.1
= control target key start
LH: loop header
LB: loop body
LE: loop exit
PB: predicated region body
PF: predicated region fallthrough
CT: control target
= control target key end

     0   :  { %s984_s15 = smov 0   ;;  %s1256_s0 = inlined_call_operand.vmem [shape: bf16[16,256], index: 0, kind: input, shape index: {}]   ;;  %s1257_s1 = inlined_call_operand.vmem [shape: bf16[256,32], index: 1, kind: input, shape index: {}]   ;;  %s1258_s2 = inlined_call_operand.vmem [shape: f32[208,256], index: 2, kind: input, shape index: {}]   ;;  %s1259_s3 = inlined_call_operand.vmem [shape: f32[8,256], index: 3, kind: input, shape index: {}]   ;;  %s1260_s4 = inlined_call_operand.vmem [shape: f32[2,8,128], index: 4, kind: output, shape index: {}]  }
   0x1 LB: > { %s809_s16 = sadd.s32 4294967295, %s951_s15   ;;  %p813_p0 = scmp.ge.s32.totalorder %s951_s15, 1  ;;  %s951_s15 = sphi %s984_s15, %s14_s15  }
   0x2   : > { %p162_p1 = scmp.lt.s32.totalorder %s951_s15, 3 }
   0x4   : > { %p163_p2 = pnand %p813_p0, %p162_p1 }
   0x5   : > { %p187_p3 = scmp.lt.s32.totalorder (!%p163_p2), %s809_s16, 1  ;;  %s956_s8 = smov (!%p163_p2), 64  }
   0x6   : > { %166 = sbr.rel (%p163_p2) target bundleno = 1429 (0x595), region = 36  ;;  %s957_s9 = smov (!%p163_p2), 32  }
   0x7   : > { %s958_s10 = smov (!%p163_p2), 96  }
   0xb   : > { %v899_v0 = vld [vmem:[%s1257_s1 + $0x38] sm:$0xff]  ;;  %v898_v2 = vld [vmem:[%s1257_s1 + $0x30] sm:$0xff]  ;;  %s1262_s16 = smov (!%p187_p3, %s809_s16), 1  ;;  %v897_v4 = vld [vmem:[%s1257_s1 + $0x28] sm:$0xff]  ;;  %v953_v6 = vmov 0.0   ;;  %vm393_vm3 = vcmask 261120  }
   0xc   : > { %v907_v1 = vld [vmem:[%s1257_s1 + $0x78] sm:$0xff]  ;;  %333 = vmatpush.bf16.msra.mxu0 %v899_v0  ;;  %v906_v3 = vld [vmem:[%s1257_s1 + $0x70] sm:$0xff]  ;;  %s891_s25 = sshll.u32 %s1262_s16, 3  ;;  %v905_v5 = vld [vmem:[%s1257_s1 + $0x68] sm:$0xff]  ;;  %v954_v61 = vmov 0   ;;  %v955_v0 = vmov 1  }
   0xd   : > { %346 = vmatpush.bf16.msra.mxu1 %v907_v1  ;;  %s1007_s28 = scalar_lea.vmem %s1260_s4, %s891_s25  ;;  %v896_v7 = vld [vmem:[%s1257_s1 + $0x20] sm:$0xff]  ;;  %v895_v9 = vld [vmem:[%s1257_s1 + $0x18] sm:$0xff]  ;;  %v894_v11 = vld [vmem:[%s1257_s1 + $0x10] sm:$0xff]  ;;  %s191_s22 = scalar_lea.vmem %s1256_s0, %s891_s25  ;;  %923 = vset.pattern.permute.xlu2 %v954_v61  ;;  %vm501_vm5 = vcmask 7168   ;;  %vm529_vm10 = vcmask 523264   ;;  %vm531_vm11 = vcmask 785408  }
   0xe   : > { %753 = vst [vmem:[%s1007_s28] sm:$0xff] %v953_v6  ;;  %v904_v8 = vld [vmem:[%s1257_s1 + $0x60] sm:$0xff]  ;;  %v903_v10 = vld [vmem:[%s1257_s1 + $0x58] sm:$0xff]  ;;  %v902_v12 = vld [vmem:[%s1257_s1 + $0x50] sm:$0xff]  ;;  %922 = vset.pattern.permute.xlu0 %v955_v0 }
   0xf   : > { %v893_v13 = vld [vmem:[%s1257_s1 + $0x8] sm:$0xff]  ;;  %v196_v15 = vld [vmem:[%s191_s22] sm:$0xff]  ;;  %v385_v22 = vld [vmem:[%s1258_s2 + $0x38] sm:$0xff] }
  0x10   : > { %334 = vmatpush.bf16.msra.mxu0 %v898_v2  ;;  %v901_v14 = vld [vmem:[%s1257_s1 + $0x48] sm:$0xff]  ;;  %v231_v16 = vunpack.c.l.b16 %v196_v15  ;;  %v232_v17 = vunpack.c.h.b16 %v196_v15  ;;  %v892_v18 = vld [vmem:[%s1257_s1] sm:$0xff]  ;;  %v384_v23 = vld [vmem:[%s1258_s2 + $0x30] sm:$0xff] }
  0x11   : > { %347 = vmatpush.bf16.msra.mxu1 %v906_v3  ;;  %v900_v19 = vld [vmem:[%s1257_s1 + $0x40] sm:$0xff]  ;;  %v383_v24 = vld [vmem:[%s1258_s2 + $0x28] sm:$0xff]  ;;  %v381_v26 = vld [vmem:[%s1258_s2 + $0x18] sm:$0xff] }
  0x12   : > { %v233_v20 = vpack.c.b16 %v231_v16, %v231_v16  ;;  %v234_v21 = vpack.c.b16 %v232_v17, %v232_v17  ;;  %v382_v25 = vld [vmem:[%s1258_s2 + $0x20] sm:$0xff]  ;;  %v380_v27 = vld [vmem:[%s1258_s2 + $0x10] sm:$0xff]  ;;  %v379_v28 = vld [vmem:[%s1258_s2 + $0x8] sm:$0xff] }
  0x13   : > { %v378_v29 = vld [vmem:[%s1258_s2] sm:$0xff]  ;;  %v440_v51 = vld [vmem:[%s1258_s2 + $0x48] sm:$0x3] }
  0x14   : > { %335 = vmatpush.bf16.msra.mxu0 %v897_v4  ;;  %v229_v30 = vld [vmem:[%s1259_s3] ss:$0 sm:$0xff]  ;;  %477 = vmatpush.xpose.msra.mxu3 %v440_v51  ;;  %v882_v52 = vld [vmem:[%s1259_s3 + $0x1] ss:$8 sm:$0x3] }
  0x15   : > { %348 = vmatpush.bf16.msra.mxu1 %v905_v5  ;;  %v439_v50 = vld [vmem:[%s1258_s2 + $0x40] sm:$0x3]  ;;  %v389_v53 = vperm.slane %v882_v52, 0  ;;  %v390_v54 = vperm.slane %v882_v52, 1  ;;  %v441_v62 = vld [vmem:[%s1259_s3 + $0x2] ss:$0 sm:$0xff] }
  0x16   : > { %v656_v0 = vld [vmem:[%s1258_s2 + $0x148] sm:$0xff] }
  0x18   : > { %336 = vmatpush.bf16.msra.mxu0 %v896_v7  ;;  %678 = vmatpush.xpose.msrb.mxu3 %v656_v0 }
  0x19   : > { %349 = vmatpush.bf16.msra.mxu1 %v904_v8 }
  0x1c   : > { %337 = vmatpush.bf16.msra.mxu0 %v895_v9 }
  0x1d   : > { %350 = vmatpush.bf16.msra.mxu1 %v903_v10 }
  0x20   : > { %338 = vmatpush.bf16.msra.mxu0 %v894_v11 }
  0x21   : > { %351 = vmatpush.bf16.msra.mxu1 %v902_v12 }
  0x24   : > { %339 = vmatpush.bf16.msra.mxu0 %v893_v13 }
  0x25   : > { %352 = vmatpush.bf16.msra.mxu1 %v901_v14 }
  0x28   : > { %340 = vmatpush.bf16.msra.mxu0 %v892_v18 }
  0x29   : > { %353 = vmatpush.bf16.msra.mxu1 %v900_v19 }
  0x2b   : > { %341 = vmatmul.bf16.vlgmr.msra.gmra.mxu0 %v233_v20 }
  0x2c   : > { %354 = vmatmul.bf16.vlgmr.msra.gmra.mxu1 %v234_v21  ;;  %409 = vmatpush.msrb.mxu0 %v384_v23 }
  0x2d   : > { %429 = vmatpush.msrb.mxu1 %v385_v22 }
  0x2e   : > { %410 = vmatpush.msrb.mxu0 %v382_v25 }
  0x2f   : > { %430 = vmatpush.msrb.mxu1 %v383_v24 }
  0x30   : > { %411 = vmatpush.msrb.mxu0 %v380_v27 }
  0x31   : > { %431 = vmatpush.msrb.mxu1 %v381_v26 }
  0x32   : > { %412 = vmatpush.msrb.mxu0 %v378_v29 }
  0x33   : > { %432 = vmatpush.msrb.mxu1 %v379_v28 }
  0x35   : > { %457 = vmatpush.xpose.msra.mxu1 %v439_v50 }
  0xa8   : > { %v342_v31 = vpop.f32.mrf.mxu0 }
  0xa9   : > { %v355_v32 = vpop.f32.mrf.mxu1  ;;  %v343_v33 = vadd.f32 %v342_v31, %v229_v30  ;;  %v886_v31 = vld [vmem:[%s1259_s3 + $0x3] ss:$8 sm:$0x3] }
  0xab   : > { %v356_v34 = vadd.f32 %v355_v32, %v343_v33  ;;  %v536_v33 = vperm.slane %v886_v31, 0 }
  0xad   : > { %v881_v35 = vmul.f32 -1.442695, %v356_v34  ;;  %v537_v34 = vperm.slane %v886_v31, 1  ;;  %v638_v31 = vld [vmem:[%s1258_s2 + $0xb8] sm:$0xff] }
  0xaf   : > { %925 = vpow2.f32 %v881_v35 }
  0xb0   : > { %v344_v36 = vpop.f32.mrf.mxu0 }
  0xb1   : > { %v357_v37 = vpop.f32.mrf.mxu1 }
  0xb5   : > { %v926_v38 = vpop.eup %925 }
  0xb6   : > { %v362_v39 = vadd.f32 1.0, %v926_v38 }
  0xb8   : > { %927 = vrcp.f32 %v362_v39  ;;  %v374_v43 = vand.u32 2147483648, %v362_v39  ;;  %v372_v45 = vand.u32 2147483647, %v362_v39  ;;  %vm368_vm1 = vweird.f32 %v362_v39 }
  0xba   : > { %v375_v47 = vor.u32 1.1754944e-38, %v374_v43  ;;  %vm373_vm4 = vcmp.eq.f32.partialorder %v372_v45, 8.507059e+37 }
  0xbe   : > { %v928_v40 = vpop.eup %927 }
  0xbf   : > { %v364_v41 = vmul.f32 %v928_v40, %v362_v39  ;;  %vm369_vm0 = vweird.f32 %v928_v40 }
  0xc0   : > { %vm370_vm2 = vmor %vm368_vm1, %vm369_vm0  ;;  %vm754_vm0 = vcmask 24576  }
  0xc1   : > { %v365_v42 = vsub.f32 1.0, %v364_v41 }
  0xc3   : > { %v366_v44 = vmul.f32 %v928_v40, %v365_v42 }
  0xc5   : > { %v367_v46 = vadd.f32 %v928_v40, %v366_v44 }
  0xc7   : > { %v371_v48 = vsel %vm370_vm2, %v928_v40, %v367_v46 }
  0xc8   : > { %v1076_v49 = vsel %vm373_vm4, %v375_v47, %v371_v48 }
  0xc9   : > { %883 = vmatmul.msk.f32.vlgmr.msrb.gmra.mxu0 %vm393_vm3, %v1076_v49  ;;  %884 = vmatmul.msk.f32.vlgmr.msrb.gmra.mxu1 %vm393_vm3, %v1076_v49 }
 0x146   : > { %v414_v55 = vpop.f32.mrf.mxu0  ;;  %v434_v56 = vpop.f32.mrf.mxu1 }
 0x147   : > { %v415_v57 = vadd.f32 %v414_v55, %v389_v53  ;;  %v435_v58 = vadd.f32 %v434_v56, %v390_v54 }
 0x149   : > { %929 = vtanh.f32 %v415_v57 }
 0x14a   : > { %931 = vtanh.f32 %v435_v58 }
 0x14f   : > { %v930_v59 = vpop.eup %929 }
 0x150   : > { %v932_v60 = vpop.eup %931  ;;  %458 = vmatmul.f32.vlgmr.msra.gmra.mxu1 %v930_v59 }
 0x151   : > { %478 = vmatmul.f32.vlgmr.msra.gmra.mxu3 %v932_v60 }
 0x1cd   : > { %v459_v63 = vpop.f32.mrf.mxu1 }
 0x1ce   : > { %v460_v1 = vadd.f32 %v459_v63, %v441_v62  ;;  %v655_v63 = vld [vmem:[%s1258_s2 + $0x140] sm:$0xff] }
 0x1cf   : > { %658 = vmatpush.xpose.msra.mxu2 %v655_v63 }
 0x1d4   : > { %v479_v2 = vpop.f32.mrf.mxu3 }
 0x1d5   : > { %v480_v3 = vadd.f32 %v479_v2, %v460_v1  ;;  %v653_v1 = vld [vmem:[%s1258_s2 + $0x130] sm:$0xff]  ;;  %v654_v2 = vld [vmem:[%s1258_s2 + $0x138] sm:$0xff] }
 0x1d6   : > { %659 = vmatpush.xpose.msra.mxu2 %v653_v1  ;;  %679 = vmatpush.xpose.msrb.mxu3 %v654_v2  ;;  %v700_v2 = vld [vmem:[%s1258_s2 + $0x160] sm:$0xff] }
 0x1d7   : > { %v885_v4 = vmul.f32 -1.442695, %v480_v3  ;;  %v502_v5 = vsel %vm501_vm5, %v480_v3, -inf }
 0x1d8   : > { %v503_v6 = vrot.slane %v502_v5, 4 }
 0x1d9   : > { %933 = vpow2.f32 %v885_v4  ;;  %v652_v4 = vld [vmem:[%s1258_s2 + $0x128] sm:$0xff] }
 0x1da   : > { %v504_v7 = vmax.f32 %v502_v5, %v503_v6  ;;  %680 = vmatpush.xpose.msrb.mxu3 %v652_v4  ;;  %v649_v5 = vld [vmem:[%s1258_s2 + $0x110] sm:$0xff]  ;;  %v650_v6 = vld [vmem:[%s1258_s2 + $0x118] sm:$0xff] }
 0x1db   : > { %v725_v4 = vld [vmem:[%s1258_s2 + $0x190] sm:$0xf] }
 0x1dc   : > { %v505_v8 = vrot.slane %v504_v7, 2  ;;  %887 = vmatpush.xpose.msk.msrb.mxu1 %vm393_vm3, %v725_v4 }
 0x1de   : > { %v506_v9 = vmax.f32 %v504_v7, %v505_v8  ;;  %681 = vmatpush.xpose.msrb.mxu3 %v650_v6  ;;  %v647_v8 = vld [vmem:[%s1258_s2 + $0x100] sm:$0xff] }
 0x1df   : > { %v934_v10 = vpop.eup %933 }
 0x1e0   : > { %v485_v11 = vadd.f32 1.0, %v934_v10  ;;  %v507_v12 = vrot.slane %v506_v9, 1 }
 0x1e2   : > { %935 = vrcp.f32 %v485_v11  ;;  %v508_v13 = vmax.f32 %v506_v9, %v507_v12  ;;  %v497_v19 = vand.u32 2147483648, %v485_v11  ;;  %v495_v21 = vand.u32 2147483647, %v485_v11  ;;  %v648_v9 = vld [vmem:[%s1258_s2 + $0x108] sm:$0xff] }
 0x1e3   : > { %vm491_vm7 = vweird.f32 %v485_v11  ;;  %682 = vmatpush.xpose.msrb.mxu3 %v648_v9  ;;  %v703_v9 = vld [vmem:[%s1259_s3 + $0x5] ss:$0 sm:$0xff] }
 0x1e4   : > { %v509_v14 = vsub.f32 %v480_v3, %v508_v13  ;;  %v498_v24 = vor.u32 1.1754944e-38, %v497_v19  ;;  %vm496_vm9 = vcmp.eq.f32.partialorder %v495_v21, 8.507059e+37  ;;  %v651_v3 = vld [vmem:[%s1258_s2 + $0x120] sm:$0xff] }
 0x1e5   : > { %660 = vmatpush.xpose.msra.mxu2 %v651_v3  ;;  %v699_v3 = vld [vmem:[%s1258_s2 + $0x150] sm:$0xff] }
 0x1e6   : > { %v510_v15 = vmul.f32 1.442695, %v509_v14 }
 0x1e8   : > { %v936_v16 = vpop.eup %935  ;;  %937 = vpow2.f32 %v510_v15 }
 0x1e9   : > { %v487_v17 = vmul.f32 %v936_v16, %v485_v11  ;;  %vm492_vm6 = vweird.f32 %v936_v16  ;;  %661 = vmatpush.xpose.msra.mxu2 %v649_v5 }
 0x1ea   : > { %vm493_vm8 = vmor %vm491_vm7, %vm492_vm6 }
 0x1eb   : > { %v488_v18 = vsub.f32 1.0, %v487_v17 }
 0x1ed   : > { %v489_v20 = vmul.f32 %v936_v16, %v488_v18  ;;  %662 = vmatpush.xpose.msra.mxu2 %v647_v8 }
 0x1ee   : > { %v938_v22 = vpop.eup %937 }
 0x1ef   : > { %552 = vperm.xlu2 %923, %v938_v22   ;;  %v490_v23 = vadd.f32 %v936_v16, %v489_v20  ;;  %v645_v22 = vld [vmem:[%s1258_s2 + $0xf0] sm:$0xff] }
 0x1f1   : > { %v494_v25 = vsel %vm493_vm8, %v936_v16, %v490_v23  ;;  %v646_v23 = vld [vmem:[%s1258_s2 + $0xf8] sm:$0xff]  ;;  %663 = vmatpush.xpose.msra.mxu2 %v645_v22 }
 0x1f2   : > { %v499_v26 = vsel %vm496_vm9, %v498_v24, %v494_v25  ;;  %683 = vmatpush.xpose.msrb.mxu3 %v646_v23  ;;  %v643_v24 = vld [vmem:[%s1258_s2 + $0xe0] sm:$0xff]  ;;  %v644_v25 = vld [vmem:[%s1258_s2 + $0xe8] sm:$0xff] }
 0x1f3   : > { %514 = vperm.xlu0 %922, %v499_v26   ;;  %v641_v26 = vld [vmem:[%s1258_s2 + $0xd0] sm:$0xff] }
 0x1f5   : > { %664 = vmatpush.xpose.msra.mxu2 %v643_v24 }
 0x1f6   : > { %684 = vmatpush.xpose.msrb.mxu3 %v644_v25 }
 0x1f9   : > { %665 = vmatpush.xpose.msra.mxu2 %v641_v26 }
 0x1fb   : > { %924 = vset.pattern.permute.xlu0 %v954_v61 }
 0x249   : > { %v553_v47 = vpop.permute.xlu2 %552 }
 0x265   : > { %v515_v27 = vpop.permute.xlu0 %514 }
 0x266   : > { %v517_v28 = vmul.f32 %v515_v27, %v1076_v49  ;;  %v642_v27 = vld [vmem:[%s1258_s2 + $0xd8] sm:$0xff] }
 0x267   : > { %685 = vmatpush.xpose.msrb.mxu3 %v642_v27 }
 0x268   : > { %522 = vrot.lane.b32.xlu1 %v517_v28, %s956_s8  ;;  %519 = vrot.lane.b32.xlu0 %v517_v28, %s957_s9 }
 0x270   : > { %525 = vrot.lane.b32.xlu1 %v517_v28, %s958_s10 }
 0x2da   : > { %v523_v29 = vpop.permute.xlu1 %522  ;;  %v520_v30 = vpop.permute.xlu0 %519 }
 0x2db   : > { %v528_v32 = vsel %vm393_vm3, %v517_v28, %v520_v30  ;;  %v639_v28 = vld [vmem:[%s1258_s2 + $0xc0] sm:$0xff]  ;;  %v637_v30 = vld [vmem:[%s1258_s2 + $0xb0] sm:$0xff] }
 0x2dc   : > { %v530_v36 = vsel %vm529_vm10, %v528_v32, %v523_v29  ;;  %v640_v29 = vld [vmem:[%s1258_s2 + $0xc8] sm:$0xff]  ;;  %666 = vmatpush.xpose.msra.mxu2 %v639_v28  ;;  %v635_v32 = vld [vmem:[%s1258_s2 + $0xa0] sm:$0xff] }
 0x2dd   : > { %686 = vmatpush.xpose.msrb.mxu3 %v640_v29 }
 0x2e0   : > { %667 = vmatpush.xpose.msra.mxu2 %v637_v30 }
 0x2e1   : > { %687 = vmatpush.xpose.msrb.mxu3 %v638_v31 }
 0x2e2   : > { %v526_v35 = vpop.permute.xlu1 %525 }
 0x2e3   : > { %v532_v37 = vsel %vm531_vm11, %v530_v36, %v526_v35  ;;  %v634_v35 = vld [vmem:[%s1258_s2 + $0x98] sm:$0xff]  ;;  %v631_v36 = vld [vmem:[%s1258_s2 + $0x80] sm:$0xff] }
 0x2e4   : > { %v540_v38 = vsub.f32 %v536_v33, %v532_v37  ;;  %v541_v39 = vsub.f32 %v537_v34, %v532_v37  ;;  %v636_v33 = vld [vmem:[%s1258_s2 + $0xa8] sm:$0xff]  ;;  %668 = vmatpush.xpose.msra.mxu2 %v635_v32  ;;  %v633_v34 = vld [vmem:[%s1258_s2 + $0x90] sm:$0xff] }
 0x2e5   : > { %688 = vmatpush.xpose.msrb.mxu3 %v636_v33  ;;  %v632_v37 = vld [vmem:[%s1258_s2 + $0x88] sm:$0xff] }
 0x2e6   : > { %v542_v40 = vmul.f32 -50.0, %v540_v38  ;;  %v543_v41 = vmul.f32 -50.0, %v541_v39 }
 0x2e8   : > { %v544_v42 = vmul.f32 %v542_v40, %v540_v38  ;;  %v545_v43 = vmul.f32 %v543_v41, %v541_v39  ;;  %669 = vmatpush.xpose.msra.mxu2 %v633_v34  ;;  %v629_v38 = vld [vmem:[%s1258_s2 + $0x70] sm:$0xff]  ;;  %v630_v39 = vld [vmem:[%s1258_s2 + $0x78] sm:$0xff]  ;;  %v627_v40 = vld [vmem:[%s1258_s2 + $0x60] sm:$0xff] }
 0x2e9   : > { %689 = vmatpush.xpose.msrb.mxu3 %v634_v35  ;;  %v628_v41 = vld [vmem:[%s1258_s2 + $0x68] sm:$0xff] }
 0x2ea   : > { %v546_v44 = vmul.f32 1.442695, %v544_v42  ;;  %v548_v45 = vmul.f32 1.442695, %v545_v43  ;;  %v625_v42 = vld [vmem:[%s1258_s2 + $0x50] sm:$0xff]  ;;  %v626_v43 = vld [vmem:[%s1258_s2 + $0x58] sm:$0xff] }
 0x2ec   : > { %939 = vpow2.f32 %v546_v44  ;;  %670 = vmatpush.xpose.msra.mxu2 %v631_v36  ;;  %v702_v44 = vld [vmem:[%s1258_s2 + $0x180] sm:$0xff] }
 0x2ed   : > { %941 = vpow2.f32 %v548_v45  ;;  %690 = vmatpush.xpose.msrb.mxu3 %v632_v37  ;;  %716 = vmatpush.xpose.msra.mxu0 %v702_v44  ;;  %v701_v45 = vld [vmem:[%s1258_s2 + $0x170] sm:$0xff] }
 0x2f0   : > { %671 = vmatpush.xpose.msra.mxu2 %v629_v38 }
 0x2f1   : > { %691 = vmatpush.xpose.msrb.mxu3 %v630_v39  ;;  %717 = vmatpush.xpose.msra.mxu0 %v701_v45 }
 0x2f2   : > { %v940_v46 = vpop.eup %939 }
 0x2f3   : > { %v942_v48 = vpop.eup %941  ;;  %v555_v49 = vmul.f32 %v940_v46, %v553_v47 }
 0x2f4   : > { %v556_v50 = vmul.f32 %v942_v48, %v553_v47  ;;  %672 = vmatpush.xpose.msra.mxu2 %v627_v40 }
 0x2f5   : > { %v557_v51 = vrot.slane %v555_v49, 4  ;;  %692 = vmatpush.xpose.msrb.mxu3 %v628_v41  ;;  %718 = vmatpush.xpose.msra.mxu0 %v700_v2 }
 0x2f6   : > { %v563_v52 = vrot.slane %v556_v50, 4 }
 0x2f7   : > { %v558_v53 = vadd.f32 %v557_v51, %v555_v49 }
 0x2f8   : > { %v564_v54 = vadd.f32 %v563_v52, %v556_v50  ;;  %673 = vmatpush.xpose.msra.mxu2 %v625_v42 }
 0x2f9   : > { %v559_v55 = vrot.slane %v558_v53, 2  ;;  %693 = vmatpush.xpose.msrb.mxu3 %v626_v43  ;;  %719 = vmatpush.xpose.msra.mxu0 %v699_v3 }
 0x2fa   : > { %v565_v57 = vrot.slane %v564_v54, 2 }
 0x2fb   : > { %v560_v56 = vadd.f32 %v559_v55, %v558_v53 }
 0x2fc   : > { %v566_v60 = vadd.f32 %v565_v57, %v564_v54 }
 0x2fd   : > { %v561_v58 = vrot.slane %v560_v56, 1 }
 0x2fe   : > { %v567_v61 = vrot.slane %v566_v60, 1 }
 0x2ff   : > { %v1104_v59 = vadd.f32 %v561_v58, %v560_v56 }
 0x300   : > { %v1112_v62 = vadd.f32 %v567_v61, %v566_v60 }
 0x301   : > { %578 = vrot.lane.b32.xlu1 %v1104_v59, %s957_s9  ;;  %574 = vrot.lane.b32.xlu0 %v1104_v59, %s956_s8 }
 0x302   : > { %570 = vrot.lane.b32.xlu2 %v1104_v59, %s958_s10 }
 0x309   : > { %592 = vrot.lane.b32.xlu1 %v1112_v62, %s957_s9  ;;  %588 = vrot.lane.b32.xlu0 %v1112_v62, %s956_s8 }
 0x30a   : > { %584 = vrot.lane.b32.xlu2 %v1112_v62, %s958_s10 }
 0x35c   : > { %v571_v7 = vpop.permute.xlu2 %570 }
 0x35d   : > { %v573_v10 = vadd.f32 %v571_v7, %v1104_v59 }
 0x364   : > { %v585_v16 = vpop.permute.xlu2 %584 }
 0x373   : > { %v579_v11 = vpop.permute.xlu1 %578  ;;  %v575_v12 = vpop.permute.xlu0 %574 }
 0x374   : > { %v577_v13 = vadd.f32 %v575_v12, %v573_v10 }
 0x376   : > { %v581_v14 = vadd.f32 %v579_v11, %v577_v13  ;;  %v726_v13 = vld [vmem:[%s1259_s3 + $0x6] ss:$0 sm:$0xff] }
 0x378   : > { %v582_v15 = vadd.f32 %v581_v14, %v1112_v62 }
 0x37a   : > { %v587_v17 = vadd.f32 %v585_v16, %v582_v15 }
 0x37b   : > { %v589_v18 = vpop.permute.xlu0 %588  ;;  %v593_v20 = vpop.permute.xlu1 %592 }
 0x37c   : > { %v591_v19 = vadd.f32 %v589_v18, %v587_v17 }
 0x37e   : > { %v595_v21 = vadd.f32 %v593_v20, %v591_v19 }
 0x380   : > { %603 = vrot.lane.b32.xlu1 %v595_v21, %s958_s10  ;;  %600 = vrot.lane.b32.xlu0 %v595_v21, %s956_s8 }
 0x381   : > { %597 = vrot.lane.b32.xlu2 %v595_v21, %s957_s9 }
 0x3db   : > { %v598_v46 = vpop.permute.xlu2 %597 }
 0x3dc   : > { %v606_v47 = vsel %vm393_vm3, %v595_v21, %v598_v46 }
 0x3f2   : > { %v604_v48 = vpop.permute.xlu1 %603  ;;  %v601_v49 = vpop.permute.xlu0 %600 }
 0x3f3   : > { %v607_v50 = vsel %vm529_vm10, %v606_v47, %v601_v49 }
 0x3f4   : > { %v608_v51 = vsel %vm531_vm11, %v607_v50, %v604_v48 }
 0x3f5   : > { %943 = vrcp.f32 %v608_v51  ;;  %v620_v55 = vand.u32 2147483648, %v608_v51  ;;  %v618_v57 = vand.u32 2147483647, %v608_v51  ;;  %vm614_vm13 = vweird.f32 %v608_v51 }
 0x3f7   : > { %v621_v60 = vor.u32 1.1754944e-38, %v620_v55  ;;  %vm619_vm15 = vcmp.eq.f32.partialorder %v618_v57, 8.507059e+37 }
 0x3fb   : > { %v944_v52 = vpop.eup %943 }
 0x3fc   : > { %v610_v53 = vmul.f32 %v944_v52, %v608_v51  ;;  %vm615_vm12 = vweird.f32 %v944_v52 }
 0x3fd   : > { %vm616_vm14 = vmor %vm614_vm13, %vm615_vm12 }
 0x3fe   : > { %v611_v54 = vsub.f32 1.0, %v610_v53 }
 0x400   : > { %v612_v56 = vmul.f32 %v944_v52, %v611_v54 }
 0x402   : > { %v613_v58 = vadd.f32 %v944_v52, %v612_v56 }
 0x404   : > { %v617_v61 = vsel %vm616_vm14, %v944_v52, %v613_v58 }
 0x405   : > { %v622_v63 = vsel %vm619_vm15, %v621_v60, %v617_v61 }
 0x406   : > { %v623_v0 = vmul.f32 %v622_v63, %v1104_v59  ;;  %v624_v1 = vmul.f32 %v622_v63, %v1112_v62  ;;  %v657_v59 = vld [vmem:[%s1259_s3 + $0x4] ss:$0 sm:$0xff] }
 0x408   : > { %674 = vmatmul.f32.vlgmr.msra.gmra.mxu2 %v623_v0  ;;  %694 = vmatmul.f32.vlgmr.msrb.gmra.mxu3 %v624_v1 }
 0x48b   : > { %v675_v62 = vpop.f32.mrf.mxu2  ;;  %v695_v6 = vpop.f32.mrf.mxu3 }
 0x48c   : > { %v676_v5 = vadd.f32 %v675_v62, %v657_v59 }
 0x48e   : > { %v696_v7 = vadd.f32 %v695_v6, %v676_v5 }
 0x490   : > { %v698_v8 = vmax.f32 %v696_v7, 0.0 }
 0x492   : > { %720 = vmatmul.f32.vlgmr.msra.gmra.mxu0 %v698_v8 }
 0x50f   : > { %v721_v10 = vpop.f32.mrf.mxu0 }
 0x510   : > { %v722_v11 = vadd.f32 %v721_v10, %v703_v9 }
 0x512   : > { %v724_v12 = vmax.f32 %v722_v11, 0.0 }
 0x514   : > { %888 = vmatmul.msk.f32.vlgmr.msrb.gmra.mxu1 %vm393_vm3, %v724_v12 }
 0x591   : > { %v750_v14 = vpop.f32.mrf.mxu1 }
 0x592   : > { %v751_v15 = vadd.f32 %v750_v14, %v726_v13 }
 0x594   : > { %755 = vst.msk [vmem:[%s1007_s28] sm:$0x1] %vm754_vm0, %v751_v15 }
 0x595 PF: > { %s14_s15 = sadd.s32 1, %s951_s15  }
 0x596   : > { %p11_p4 = scmp.ge.s32.totalorder %s14_s15, 4  }
 0x598   :  { %13 = sbr.rel (!%p11_p4) target bundleno = 1 (0x1), region = 68 }

</bundles_post_ra>
